<compile_context>
chip_gen: v5e
topology: v5e:2x2
jax: 0.10.0
libtpu: 0.0.40
codegen_flags: <defaults>
</compile_context>

<pallas_src>
import functools

import jax
import jax.numpy as jnp
from jax.experimental import pallas as pl
from jax.experimental.pallas import tpu as pltpu


def _round_up(x: int, m: int) -> int:
    return ((x + m - 1) // m) * m


# --------------------------------------------------------------------------
# Kernels
# --------------------------------------------------------------------------
def _lb_full_kernel(*refs, use_norm: bool, use_bias: bool, eps: float):
    """Full-K tile: optional LayerNorm -> matmul -> bias -> relu."""
    idx = 0
    x_ref = refs[idx]; idx += 1
    w_ref = refs[idx]; idx += 1
    b_ref = None
    if use_bias:
        b_ref = refs[idx]; idx += 1
    g_ref = beta_ref = None
    if use_norm:
        g_ref, beta_ref = refs[idx], refs[idx + 1]; idx += 2
    o_ref = refs[idx]

    x = x_ref[...]                                           # (tm, K) native dtype
    if use_norm:
        # Two-pass LayerNorm in f32 (no K padding in this path -> no masking).
        xf = x.astype(jnp.float32)
        mean = jnp.mean(xf, axis=-1, keepdims=True)
        d = xf - mean
        var = jnp.mean(d * d, axis=-1, keepdims=True)
        rstd = jax.lax.rsqrt(var + eps)
        xn = d * rstd * g_ref[...] + beta_ref[...]
        x = xn.astype(x_ref.dtype)                           # matches PyTorch LN output dtype

    y = jnp.dot(x, w_ref[...], preferred_element_type=jnp.float32)  # MXU, f32 acc
    if use_bias:
        y = y + b_ref[...]
    # Dropout with p=0.0 (module default) / eval mode is the identity.
    o_ref[...] = jnp.maximum(y, 0.0).astype(o_ref.dtype)


def _lb_ktiled_kernel(*refs, use_norm: bool, use_bias: bool):
    """K-tiled tile: accumulate partial matmuls over the 'arbitrary' K axis."""
    idx = 0
    x_ref = refs[idx]; idx += 1
    w_ref = refs[idx]; idx += 1
    b_ref = None
    if use_bias:
        b_ref = refs[idx]; idx += 1
    g_ref = beta_ref = mean_ref = rstd_ref = None
    if use_norm:
        g_ref, beta_ref, mean_ref, rstd_ref = refs[idx:idx + 4]; idx += 4
    o_ref = refs[idx]
    acc_ref = refs[idx + 1]

    k = pl.program_id(2)

    @pl.when(k == 0)
    def _():
        acc_ref[...] = jnp.zeros_like(acc_ref)

    x = x_ref[...]                                           # (tm, tk)
    if use_norm:
        # Stats precomputed per row (full-K reduction done outside this kernel).
        xf = x.astype(jnp.float32)
        xn = (xf - mean_ref[...]) * rstd_ref[...] * g_ref[...] + beta_ref[...]
        x = xn.astype(x_ref.dtype)

    acc_ref[...] += jnp.dot(x, w_ref[...], preferred_element_type=jnp.float32)

    @pl.when(k == pl.num_programs(2) - 1)
    def _():
        y = acc_ref[...]
        if use_bias:
            y = y + b_ref[...]
        o_ref[...] = jnp.maximum(y, 0.0).astype(o_ref.dtype)


# --------------------------------------------------------------------------
# Wrapper
# --------------------------------------------------------------------------
def linear_block(x, w, b=None, gamma=None, beta=None, *, use_norm=False,
                 use_bias=True, eps=1e-5, row_tile=None, k_tile=None,
                 max_col_tile=None):
    """Apply LinearBlock forward to x of shape (N, C, in_len) -> (N, C, out_len).

    w is (in_len, out_len) (= PyTorch weight.T); b is (1, out_len) or (out_len,);
    gamma/beta are (1, in_len) or (in_len,).
    """
    N, C, in_len = x.shape
    out_len = w.shape[1]
    M = N * C

    itemsize = jnp.dtype(x.dtype).itemsize
    sub = {4: 8, 2: 16, 1: 32}.get(itemsize, 8)          # dtype-aware sublane quantum

    # ---- VMEM budget (generation-aware, with headroom) --------------------
    try:
        vmem_cap = int(pltpu.get_tpu_info().vmem_capacity_bytes)
    except Exception:
        vmem_cap = 64 << 20                              # conservative (v7x-sized)
    budget = int(0.8 * vmem_cap)

    # ---- N (output) padding: 256-multiples feed the 2x256 MXU on v6e/v7x --
    Np = _round_up(out_len, 128 if out_len <= 128 else 256)

    # ---- K tiling decision -------------------------------------------------
    if k_tile is not None:
        tk = _round_up(min(int(k_tile), in_len), 128)
    else:
        # Whole K unless the K-slabs at modest tiles would blow the budget.
        denom = 2 * (256 + min(Np, 512)) * itemsize
        tk_cap = max(128, ((budget // 3) // denom) // 128 * 128)
        tk = in_len if in_len <= tk_cap else tk_cap
    k_tiled = tk < in_len
    if k_tiled:
        Kp = _round_up(in_len, tk)
    else:
        tk = in_len                                      # full-dim block: no K pad of x
        Kp = in_len

    # ---- column tile: prefer full weight residency -------------------------
    w_total_bytes = Kp * Np * itemsize
    if max_col_tile is not None:
        tn = max(128, min(Np, _round_up(int(max_col_tile), 128)))
        while Np % tn != 0:
            tn -= 128
    elif (not k_tiled) and 2 * w_total_bytes <= int(0.45 * budget):
        tn = Np                                          # resident: one weight DMA total
    else:
        tn = 512 if Np % 512 == 0 else (256 if Np % 256 == 0 else 128)
        tn = min(tn, Np)
    J = Np // tn

    # ---- row tile (budget-aware; includes f32 temporaries in the estimate) -
    if row_tile is None:
        row_tile = 1024 if budget >= (80 << 20) else (512 if budget >= (48 << 20) else 256)
    tm = _round_up(min(int(row_tile), max(M, sub)), sub)

    def _vmem_need(tm_):
        need = 2 * tm_ * tk * itemsize                   # x tile (double-buffered)
        need += 2 * tk * tn * itemsize                   # weight tile
        need += 2 * tm_ * tn * itemsize                  # output tile
        need += tm_ * tn * 4                             # f32 matmul result / accumulator
        if use_bias:
            need += 2 * tn * 4
        if use_norm:
            need += 2 * 2 * tk * 4                       # gamma, beta
            need += 2 * tm_ * tk * 4                     # f32 normalized-x temporaries
            need += 4 * tm_ * 4                          # per-row stats
        return need

    while _vmem_need(tm) > budget and tm > sub:
        tm = max(sub, _round_up(tm // 2, sub))

    Mp = _round_up(M, tm)
    I = Mp // tm
    # v7x dual-TensorCore: make sure a 'parallel' axis has >= 2 programs if possible.
    if I * J == 1 and tm % (2 * sub) == 0:
        tm //= 2
        I = Mp // tm

    # ---- pad operands (only when required) ---------------------------------
    x2 = x.reshape(M, in_len)
    if Mp != M or Kp != in_len:
        x2 = jnp.pad(x2, ((0, Mp - M), (0, Kp - in_len)))
    wp = w.astype(x.dtype)
    if Kp != in_len or Np != out_len:
        wp = jnp.pad(wp, ((0, Kp - in_len), (0, Np - out_len)))

    operands = [x2, wp]
    bp = gp = betap = None
    if use_bias:
        bp = jnp.asarray(b, jnp.float32).reshape(1, -1)
        if Np != out_len:
            bp = jnp.pad(bp, ((0, 0), (0, Np - out_len)))
        operands.append(bp)
    if use_norm:
        gp = jnp.asarray(gamma, jnp.float32).reshape(1, -1)
        betap = jnp.asarray(beta, jnp.float32).reshape(1, -1)
        if Kp != in_len:
            gp = jnp.pad(gp, ((0, 0), (0, Kp - in_len)))
            betap = jnp.pad(betap, ((0, 0), (0, Kp - in_len)))
        operands += [gp, betap]
        if k_tiled:
            # Precompute per-row LayerNorm stats once (kernel only applies them).
            xf = x.reshape(M, in_len).astype(jnp.float32)
            mean = jnp.mean(xf, axis=-1, keepdims=True)
            var = jnp.mean((xf - mean) ** 2, axis=-1, keepdims=True)
            rstd = jax.lax.rsqrt(var + eps)
            if Mp != M:
                mean = jnp.pad(mean, ((0, Mp - M), (0, 0)))
                rstd = jnp.pad(rstd, ((0, Mp - M), (0, 0)))
            operands += [mean, rstd]

    # ---- grid, specs, kernel ------------------------------------------------
    if not k_tiled:
        x_total_bytes = Mp * Kp * itemsize
        extra_ij = (I - 1) * w_total_bytes               # grid (I, J): weight re-read
        extra_ji = (J - 1) * x_total_bytes               # grid (J, I): x re-read
        weight_outer = (J > 1) and (extra_ji < extra_ij)
        if weight_outer:
            grid = (J, I)
            def xi(j, i): return (i, 0)
            def wi(j, i): return (0, j)
            def bi(j, i): return (0, j)
            def gi(j, i): return (0, 0)
            def oi(j, i): return (i, j)
        else:
            grid = (I, J)
            def xi(i, j): return (i, 0)
            def wi(i, j): return (0, j)
            def bi(i, j): return (0, j)
            def gi(i, j): return (0, 0)
            def oi(i, j): return (i, j)
        in_specs = [pl.BlockSpec((tm, Kp), xi), pl.BlockSpec((Kp, tn), wi)]
        if use_bias:
            in_specs.append(pl.BlockSpec((1, tn), bi))
        if use_norm:
            in_specs += [pl.BlockSpec((1, Kp), gi), pl.BlockSpec((1, Kp), gi)]
        out_spec = pl.BlockSpec((tm, tn), oi)
        dims = ("parallel", "parallel")
        scratch = ()
        kernel = functools.partial(_lb_full_kernel, use_norm=use_norm,
                                   use_bias=use_bias, eps=float(eps))
    else:
        Kt = Kp // tk
        grid = (I, J, Kt)
        in_specs = [pl.BlockSpec((tm, tk), lambda i, j, k: (i, k)),
                    pl.BlockSpec((tk, tn), lambda i, j, k: (k, j))]
        if use_bias:
            in_specs.append(pl.BlockSpec((1, tn), lambda i, j, k: (0, j)))
        if use_norm:
            in_specs += [pl.BlockSpec((1, tk), lambda i, j, k: (0, k)),
                         pl.BlockSpec((1, tk), lambda i, j, k: (0, k)),
                         pl.BlockSpec((tm, 1), lambda i, j, k: (i, 0)),
                         pl.BlockSpec((tm, 1), lambda i, j, k: (i, 0))]
        out_spec = pl.BlockSpec((tm, tn), lambda i, j, k: (i, j))
        dims = ("parallel", "parallel", "arbitrary")
        scratch = (pltpu.VMEM((tm, tn), jnp.float32),)
        kernel = functools.partial(_lb_ktiled_kernel, use_norm=use_norm,
                                   use_bias=use_bias)

    cost = pl.CostEstimate(
        flops=2 * M * in_len * out_len,
        transcendentals=M if use_norm else 0,
        bytes_accessed=(M * in_len + in_len * out_len + out_len
                        + M * out_len) * itemsize,
    )

    out2 = pl.pallas_call(
        kernel,
        out_shape=jax.ShapeDtypeStruct((Mp, Np), x.dtype),
        grid_spec=pltpu.PrefetchScalarGridSpec(
            num_scalar_prefetch=0,
            grid=grid,
            in_specs=in_specs,
            out_specs=out_spec,
            scratch_shapes=scratch,
        ),
        compiler_params=pltpu.CompilerParams(
            dimension_semantics=dims,
            vmem_limit_bytes=int(budget)),
        cost_estimate=cost,
    )(*operands)

    return out2[:M, :out_len].reshape(N, C, out_len)


# --------------------------------------------------------------------------
# Plain-JAX reference (matches the PyTorch forward)
# --------------------------------------------------------------------------
def linear_block_ref(x, w, b=None, gamma=None, beta=None, *, use_norm=False,
                     use_bias=True, eps=1e-5):
    xf = x.astype(jnp.float32)
    if use_norm:
        mean = jnp.mean(xf, axis=-1, keepdims=True)
        var = jnp.mean((xf - mean) ** 2, axis=-1, keepdims=True)
        xf = (xf - mean) * jax.lax.rsqrt(var + eps)
        xf = xf * jnp.asarray(gamma, jnp.float32).reshape(-1) \
             + jnp.asarray(beta, jnp.float32).reshape(-1)
    y = jnp.matmul(xf, w.astype(jnp.float32),
                   precision=jax.lax.Precision.HIGHEST)
    if use_bias:
        y = y + jnp.asarray(b, jnp.float32).reshape(-1)
    return jnp.maximum(y, 0.0).astype(x.dtype)


def _check(name, out, ref):
    err = float(jnp.max(jnp.abs(out.astype(jnp.float32) - ref.astype(jnp.float32))))
    scale = float(jnp.max(jnp.abs(ref.astype(jnp.float32)))) + 1e-6
    assert err <= 1e-2 * scale + 1e-4, f"{name}: max abs err {err} (scale {scale})"


if __name__ == "__main__":
    def make_inputs(key, N, C, in_len, out_len):
        kx, kw, kb, kg, kbe = jax.random.split(key, 5)
        bound = 1.0 / (in_len ** 0.5)
        x = jax.random.normal(kx, (N, C, in_len), dtype=jnp.float32)
        w = jax.random.uniform(kw, (in_len, out_len), jnp.float32, -bound, bound)  # = W.T
        b = jax.random.uniform(kb, (1, out_len), jnp.float32, -bound, bound)
        gamma = 1.0 + 0.1 * jax.random.normal(kg, (1, in_len), dtype=jnp.float32)
        beta = 0.1 * jax.random.normal(kbe, (1, in_len), dtype=jnp.float32)
        return x, w, b, gamma, beta

    key = jax.random.PRNGKey(0)
    k1, k2 = jax.random.split(key)

    # --- Config 1: module defaults at small shapes (weight-resident path) ---
    x, w, b, gamma, beta = make_inputs(k1, N=2, C=4, in_len=32, out_len=64)

    out = jax.block_until_ready(linear_block(x, w, b, gamma, beta,
                                             use_norm=False, use_bias=True))
    assert out.shape == (2, 4, 64)
    _check("no-norm", out, linear_block_ref(x, w, b, gamma, beta,
                                            use_norm=False, use_bias=True))

    out_n = jax.block_until_ready(linear_block(x, w, b, gamma, beta,
                                               use_norm=True, use_bias=True))
    _check("norm", out_n, linear_block_ref(x, w, b, gamma, beta,
                                           use_norm=True, use_bias=True))

    # --- Config 2: exercise column-tiled and K-tiled paths (forced tiles) ---
    x2, w2, b2, g2, be2 = make_inputs(k2, N=4, C=8, in_len=384, out_len=256)
    ref2 = linear_block_ref(x2, w2, b2, g2, be2, use_norm=False, use_bias=True)
    ref2n = linear_block_ref(x2, w2, b2, g2, be2, use_norm=True, use_bias=True)

    out2 = jax.block_until_ready(linear_block(x2, w2, b2, g2, be2,
                                              use_norm=False, use_bias=True,
                                              max_col_tile=128))
    _check("col-tiled", out2, ref2)

    out3 = jax.block_until_ready(linear_block(x2, w2, b2, g2, be2,
                                              use_norm=False, use_bias=True,
                                              k_tile=128, max_col_tile=128))
    _check("k-tiled", out3, ref2)

    out4 = jax.block_until_ready(linear_block(x2, w2, b2, g2, be2,
                                              use_norm=True, use_bias=True,
                                              k_tile=128, max_col_tile=128))
    _check("k-tiled-norm", out4, ref2n)

    print("KERNEL_OK")
</pallas_src>

<mosaic_0001>
module attributes {stable_mosaic.version = 11 : i64} {
  func.func @_lb_full_kernel(%arg0: i32, %arg1: i32, %arg2: memref<8x32xf32, #tpu.memory_space<vmem>>, %arg3: memref<32x128xf32, #tpu.memory_space<vmem>>, %arg4: memref<1x128xf32, #tpu.memory_space<vmem>>, %arg5: memref<8x128xf32, #tpu.memory_space<vmem>>) attributes {dimension_semantics = [#tpu.dimension_semantics<parallel>, #tpu.dimension_semantics<parallel>], iteration_bounds = array<i64: 1, 1>, scalar_prefetch = 0 : i64, scratch_operands = 0 : i64, tpu.core_type = #tpu.core_type<tc>, window_params = [{transform_indices = @transform_0, window_bounds = array<i64: 8, 32>}, {transform_indices = @transform_1, window_bounds = array<i64: 32, 128>}, {transform_indices = @transform_2, window_bounds = array<i64: 1, 128>}, {transform_indices = @transform_3, window_bounds = array<i64: 8, 128>}]} {
    %c0 = arith.constant 0 : index
    %c0_0 = arith.constant 0 : index
    %0 = vector.load %arg2[%c0, %c0_0] : memref<8x32xf32, #tpu.memory_space<vmem>>, vector<8x32xf32>
    %c0_1 = arith.constant 0 : index
    %c0_2 = arith.constant 0 : index
    %1 = vector.load %arg3[%c0_1, %c0_2] : memref<32x128xf32, #tpu.memory_space<vmem>>, vector<32x128xf32>
    %cst = arith.constant dense<0.000000e+00> : vector<8x128xf32>
    %2 = tpu.matmul %0, %1, %cst {dimension_numbers = #tpu.dot_dimension_numbers<[1], [0], [0], [1], [0, 0, 1, 1], [], []>} : vector<8x32xf32>, vector<32x128xf32>, vector<8x128xf32> -> vector<8x128xf32>
    %c0_3 = arith.constant 0 : index
    %c0_4 = arith.constant 0 : index
    %3 = vector.load %arg4[%c0_3, %c0_4] : memref<1x128xf32, #tpu.memory_space<vmem>>, vector<1x128xf32>
    %4 = vector.broadcast %3 : vector<1x128xf32> to vector<8x128xf32>
    %5 = arith.addf %2, %4 : vector<8x128xf32>
    %cst_5 = arith.constant 0.000000e+00 : f32
    %6 = vector.broadcast %cst_5 : f32 to vector<8x128xf32>
    %7 = arith.maximumf %5, %6 : vector<8x128xf32>
    %c0_6 = arith.constant 0 : index
    %c0_7 = arith.constant 0 : index
    %8 = vector.load %arg5[%c0_6, %c0_7] : memref<8x128xf32, #tpu.memory_space<vmem>>, vector<8x128xf32>
    tpu.vector_store %arg5[%c0_6, %c0_7], %7 {strides = array<i32>} : memref<8x128xf32, #tpu.memory_space<vmem>>, vector<8x128xf32>,
    return
  }
  func.func @transform_0(%arg0: i32, %arg1: i32) -> (i32, i32) {
    %c0_i32 = arith.constant 0 : i32
    %c0_i32_0 = arith.constant 0 : i32
    return %arg0, %c0_i32 : i32, i32
  }
  func.func @transform_1(%arg0: i32, %arg1: i32) -> (i32, i32) {
    %c0_i32 = arith.constant 0 : i32
    %c0_i32_0 = arith.constant 0 : i32
    return %c0_i32, %arg1 : i32, i32
  }
  func.func @transform_2(%arg0: i32, %arg1: i32) -> (i32, i32) {
    %c0_i32 = arith.constant 0 : i32
    %c0_i32_0 = arith.constant 0 : i32
    return %c0_i32, %arg1 : i32, i32
  }
  func.func @transform_3(%arg0: i32, %arg1: i32) -> (i32, i32) {
    %c0_i32 = arith.constant 0 : i32
    return %arg0, %arg1 : i32, i32
  }
}

</mosaic_0001>

<bundles_post_ra>
// kernel: tpu_custom_call.1
= control target key start
LH: loop header
LB: loop body
LE: loop exit
PB: predicated region body
PF: predicated region fallthrough
CT: control target
= control target key end

     0   :  { %8 = vsyncpa [#allocation3], 0  ;;  %s220_s0 = inlined_call_operand.hbm [shape: f32[8,32], index: 0, kind: input, shape index: {}]   ;;  %s221_s1 = inlined_call_operand.hbm [shape: f32[32,128], index: 1, kind: input, shape index: {}]   ;;  %s222_s2 = inlined_call_operand.vmem [shape: f32[1,128], index: 2, kind: input, shape index: {}]   ;;  %s223_s3 = inlined_call_operand.hbm [shape: f32[8,128], index: 3, kind: output, shape index: {}]  }
   0x1   :  { %9 = vsyncpa [#allocation6], 0 }
   0x2   :  { %10 = vsyncpa [#allocation4], 0  ;;  %s16_s14 = sshll.u32 %s220_s0, 4  ;;  %s183_s15 = smov [#allocation2]   ;;  %s17_s14 = int_to_ptr.hbm [resolvable:$true] %s16_s14 }
   0x3   :  { %s18_s16 = sshll.u32 %s183_s15, 4  ;;  %s26_s19 = sshll.u32 %s221_s1, 4  ;;  %s19_s16 = int_to_ptr.vmem [resolvable:$true] %s18_s16  ;;  %s27_s19 = int_to_ptr.hbm [resolvable:$true] %s26_s19 }
   0x4   :  { %21 = dma.hbm_to_vmem [thread:$0]  %s17_s14, 128, %s19_s16, [#allocation3]  }
   0x5   :  { %s184_s20 = smov [#allocation5]   ;;  %s185_s22 = smov 128  }
   0x6   :  { %s28_s21 = sshll.u32 %s184_s20, 4  ;;  %s186_s23 = smov 8   ;;  %s29_s21 = int_to_ptr.vmem [resolvable:$true] %s28_s21 }
   0x7   :  { %34 = dma.hbm_to_vmem [thread:$0]  %s27_s19, 512, %s29_s21, [#allocation6], %s185_s22, %s185_s22, %s186_s23  }
   0x8   :  { %177 = dma.done.wait [#allocation3], 128  }
   0x9   :  { %178 = vsyncadd [#allocation3], 4294967168 }
   0xa   :  { %179 = dma.done.wait [#allocation6], 512  }
   0xb   :  { %180 = vsyncadd [#allocation6], 4294966784  ;;  %v49_v0 = vld [vmem:[#allocation5 + $0x18] sm:$0xff]  ;;  %v48_v1 = vld [vmem:[#allocation5 + $0x10] sm:$0xff]  ;;  %vm54_vm0 = vcmask 261120   ;;  %s187_s24 = smov [#allocation7]  }
   0xc   :  { %70 = vmatpush.msra.mxu0 %v49_v0  ;;  %v47_v2 = vld [vmem:[#allocation5 + $0x8] sm:$0xff]  ;;  %v46_v3 = vld [vmem:[#allocation5] sm:$0xff]  ;;  %v45_v4 = vld [vmem:[#allocation2] sm:$0xff]  ;;  %s85_s25 = sshll.u32 %s187_s24, 4  ;;  %s87_s28 = sshll.u32 %s223_s3, 4  ;;  %s86_s25 = int_to_ptr.vmem [resolvable:$true] %s85_s25  ;;  %s88_s28 = int_to_ptr.hbm [resolvable:$true] %s87_s28 }
   0xd   :  { %v104_v5 = vld [vmem:[%s222_s2] ss:$0 sm:$0xff] }
   0xe   :  { %71 = vmatpush.msra.mxu0 %v48_v1 }
  0x10   :  { %72 = vmatpush.msra.mxu0 %v47_v2 }
  0x12   :  { %73 = vmatpush.msra.mxu0 %v46_v3 }
  0x13   :  { %98 = vmatmul.msk.f32.vlgmr.msra.gmra.mxu0 %vm54_vm0, %v45_v4 }
  0x90   :  { %v75_v6 = vpop.f32.mrf.mxu0 }
  0x91   :  { %v76_v7 = vadd.f32 %v104_v5, %v75_v6 }
  0x93   :  { %v78_v8 = vmax.f32 %v76_v7, 0.0 }
  0x95   :  { %79 = vst [vmem:[#allocation7] sm:$0xff] %v78_v8 }
  0x96   :  { %90 = dma.vmem_to_hbm [thread:$0]  %s86_s25, 128, %s88_s28, [#allocation4]  }
  0x97   :  { %181 = dma.done.wait [#allocation4], 128  }
  0x98   :  { %182 = vsyncadd [#allocation4], 4294967168 }
  0x99   :  { %95 = vsyncpa [#allocation3], 1 }
  0x9a   :  { %96 = vsyncpa [#allocation6], 1 }
  0x9b   :  { %97 = vsyncpa [#allocation4], 1 }

</bundles_post_ra>
